<compile_context>
chip_gen: v7x
topology: tpu7x:2x2x1
jax: 0.10.0
libtpu: 0.0.40
codegen_flags: <defaults>
</compile_context>

<pallas_src>
import functools

import jax
import jax.numpy as jnp
from jax.experimental import pallas as pl
from jax.experimental.pallas import tpu as pltpu

SMALL = 1e-08
_LANE = 128
_VMEM_BUDGET = 40 * 1024 * 1024   # conservative working-set budget (v7x: 64 MiB VMEM)
_VMEM_LIMIT = 48 * 1024 * 1024    # scoped-VMEM limit requested from Mosaic


def _cdiv(a, b):
    return -(-a // b)


def _round_up(x, m):
    return _cdiv(x, m) * m


# ---------------------------------------------------------------------------
# Kernels
# ---------------------------------------------------------------------------

def _bottleneck_kernel_resident(training, hp, *refs):
    """Fast path: whole contraction resident in VMEM.  Grid = (batch_tiles,).

    refs (training)  : const, x, w_cat, b_cat, r_mean, cov_r_inv, noise,
                       sample_out, kl_out
    refs (inference) : same without `noise`.
    """
    if training:
        (const_ref, x_ref, w_ref, b_ref, rmean_ref, rcinv_ref, noise_ref,
         sample_ref, kl_ref) = refs
    else:
        (const_ref, x_ref, w_ref, b_ref, rmean_ref, rcinv_ref,
         sample_ref, kl_ref) = refs
        noise_ref = None

    x = x_ref[...]
    # Two half-width MXU matmuls against static ref slices of W_cat: no
    # 2*Hp-wide temporary and no value-slice copies (same total MXU work).
    mean = (jnp.dot(x, w_ref[:, :hp], preferred_element_type=jnp.float32)
            + b_ref[:, :hp])
    std = (jnp.dot(x, w_ref[:, hp:], preferred_element_type=jnp.float32)
           + b_ref[:, hp:])
    cov = std * std + SMALL

    # Reparametrisation trick (inference: sample == mean, no noise operand).
    if noise_ref is None:
        sample = mean
    else:
        sample = mean + noise_ref[...].astype(jnp.float32) * jnp.sqrt(cov)
    sample_ref[...] = sample.astype(sample_ref.dtype)

    # KL divergence: single fused per-row reduction. Batch-invariant parts
    # (sum(log cov_r) - H) arrive as one SMEM scalar; cov_r_inv is precomputed
    # and zero in padded columns; padded std columns give cov == 1 exactly.
    md = mean - rmean_ref[...]
    term = (cov + md * md) * rcinv_ref[...] - jnp.log(cov)
    kl = 0.5 * (jnp.sum(term, axis=1, keepdims=True) + const_ref[0, 0])
    kl_ref[...] = jnp.broadcast_to(kl, kl_ref.shape).astype(kl_ref.dtype)


def _bottleneck_kernel_tiled_k(training, hp, *refs):
    """Tiled-K path (large H): f32 accumulator, K axis last and "arbitrary".

    refs (training)  : const, x, w_cat, b_cat, r_mean, cov_r_inv, noise,
                       sample_out, kl_out, acc_scratch
    refs (inference) : same without `noise`.
    """
    if training:
        (const_ref, x_ref, w_ref, b_ref, rmean_ref, rcinv_ref, noise_ref,
         sample_ref, kl_ref, acc_ref) = refs
    else:
        (const_ref, x_ref, w_ref, b_ref, rmean_ref, rcinv_ref,
         sample_ref, kl_ref, acc_ref) = refs
        noise_ref = None

    k = pl.program_id(1)

    @pl.when(k == 0)
    def _():
        # Fold the bias into the accumulator init (hides under the matmul).
        acc_ref[...] = jnp.broadcast_to(b_ref[...], acc_ref.shape)

    # One fused MXU matmul accumulates [mean | std] together (bf16 in, f32 acc).
    acc_ref[...] += jnp.dot(x_ref[...], w_ref[...],
                            preferred_element_type=jnp.float32)

    @pl.when(k == pl.num_programs(1) - 1)
    def _():
        # Static ref slices (views) of the accumulator: no 2*Hp-wide temporary.
        mean = acc_ref[:, :hp]
        std = acc_ref[:, hp:]
        cov = std * std + SMALL

        if noise_ref is None:
            sample = mean
        else:
            sample = mean + noise_ref[...].astype(jnp.float32) * jnp.sqrt(cov)
        sample_ref[...] = sample.astype(sample_ref.dtype)

        md = mean - rmean_ref[...]
        term = (cov + md * md) * rcinv_ref[...] - jnp.log(cov)
        kl = 0.5 * (jnp.sum(term, axis=1, keepdims=True) + const_ref[0, 0])
        kl_ref[...] = jnp.broadcast_to(kl, kl_ref.shape).astype(kl_ref.dtype)


# ---------------------------------------------------------------------------
# Parameter prep (one-time)
# ---------------------------------------------------------------------------

def prepare_bottleneck_params(params):
    """Transpose+concat+pad+bf16-cast weights once; hoist prior statistics."""
    h = params['wm'].shape[0]
    hp = max(_LANE, _round_up(h, _LANE))
    pad_h = hp - h

    wm_t = jnp.pad(params['wm'].T, ((0, pad_h), (0, pad_h)))
    ws_t = jnp.pad(params['ws'].T, ((0, pad_h), (0, pad_h)))
    w_cat = jnp.concatenate([wm_t, ws_t], axis=1).astype(jnp.bfloat16)   # (Hp, 2Hp)

    bm = jnp.pad(params['bm'].reshape(1, h), ((0, 0), (0, pad_h)))
    # Padded std-bias columns are 1.0: their matmul contribution is exactly 0,
    # so cov = 1.0 + SMALL rounds to exactly 1.0 in f32 (log == 0), and
    # cov_r_inv is 0 there, so padding contributes nothing to the KL sum.
    bs = jnp.pad(params['bs'].reshape(1, h), ((0, 0), (0, pad_h)),
                 constant_values=1.0)
    b_cat = jnp.concatenate([bm, bs], axis=1).astype(jnp.float32)        # (1, 2Hp)

    cov_r = params['r_std'] * params['r_std'] + SMALL                    # (1, h)
    r_mean = jnp.pad(params['r_mean'], ((0, 0), (0, pad_h))).astype(jnp.float32)
    cov_r_inv = jnp.pad(1.0 / cov_r, ((0, 0), (0, pad_h))).astype(jnp.float32)
    kl_const = (jnp.sum(jnp.log(cov_r)) - jnp.float32(h)).reshape(1, 1)

    return {
        'w_cat': w_cat, 'b_cat': b_cat, 'r_mean': r_mean,
        'cov_r_inv': cov_r_inv, 'kl_const': kl_const.astype(jnp.float32),
        'hidden_dim': h, 'hidden_dim_padded': hp,
    }


# ---------------------------------------------------------------------------
# Tiling / working-set selection
# ---------------------------------------------------------------------------

def _working_set_bytes(tb, tk, hp, multi_k, training, sample_bytes):
    two_hp = 2 * hp
    ws = 2 * tb * tk * 2                 # x (bf16), double-buffered
    ws += 2 * tk * two_hp * 2            # w_cat (bf16), double-buffered
    ws += 2 * (two_hp + 2 * hp) * 4      # b_cat, r_mean, cov_r_inv (f32)
    if training:
        ws += 2 * tb * hp * 2            # noise (bf16)
    ws += 2 * tb * hp * sample_bytes     # sample output
    ws += 2 * tb * _LANE * 4             # lane-dense KL output
    if multi_k:
        ws += tb * two_hp * 4            # f32 accumulator scratch
    ws += 4 * tb * hp * 4                # epilogue temporaries headroom
    return ws


def _choose_tiles(b, hp, batch_tile, k_tile, training, sample_bytes, budget):
    # Batch tiling: minimize padding, keep 16-row (bf16) alignment, and use
    # >=2 tiles when the batch is big enough so both v7x TensorCores get work.
    b16 = _round_up(max(b, 1), 16)
    if b16 <= batch_tile:
        n_b = 2 if b16 >= 64 else 1
    else:
        n_b = _cdiv(b, batch_tile)
    tb = _round_up(_cdiv(b, n_b), 16)

    # K tiling: keep the whole contraction (and W_cat) VMEM-resident whenever
    # it fits the budget; otherwise tile K and accumulate in f32 scratch.
    k_tile = max(_LANE, (k_tile // _LANE) * _LANE)
    tk, n_k = hp, 1
    if _working_set_bytes(tb, tk, hp, False, training, sample_bytes) > budget:
        tk = min(k_tile, hp)
        n_k = _cdiv(hp, tk)
        while (_working_set_bytes(tb, tk, hp, True, training, sample_bytes)
               > budget and tk > _LANE):
            tk = max(_LANE, (tk // 2) // _LANE * _LANE)
            n_k = _cdiv(hp, tk)

    # Shrink the batch tile if still over budget.
    while (_working_set_bytes(tb, tk, hp, n_k > 1, training, sample_bytes)
           > budget and tb > 16):
        tb = max(16, (tb // 2) // 16 * 16)

    n_b = _cdiv(b, tb)
    bp = n_b * tb
    hk = n_k * tk
    return tb, bp, tk, hk, n_k


# ---------------------------------------------------------------------------
# Forward wrapper
# ---------------------------------------------------------------------------

def bottleneck_forward(hidden_state, prep, training_mode, rng_key=None, *,
                       batch_tile=256, k_tile=512, sample_dtype=jnp.float32,
                       vmem_budget=_VMEM_BUDGET):
    """Pallas-backed forward pass.

    Args:
      hidden_state: (B, H) float32
      prep: output of prepare_bottleneck_params
      training_mode: 'training' | 'inference'
      rng_key: key for the reparametrisation noise (training only)
    Returns:
      (sample (B, H), kl_div (B,) float32)
    """
    b, h = hidden_state.shape
    assert h == prep['hidden_dim']
    hp = prep['hidden_dim_padded']
    two_hp = 2 * hp
    training = (training_mode != 'inference')
    sample_bytes = jnp.dtype(sample_dtype).itemsize

    tb, bp, tk, hk, n_k = _choose_tiles(b, hp, batch_tile, k_tile, training,
                                        sample_bytes, vmem_budget)
    multi_k = n_k > 1
    n_b = bp // tb

    x_p = jnp.pad(hidden_state, ((0, bp - b), (0, hk - h))).astype(jnp.bfloat16)
    w_cat = prep['w_cat']
    if hk > hp:  # zero-pad the contraction dim; zero rows contribute nothing
        w_cat = jnp.pad(w_cat, ((0, hk - hp), (0, 0)))

    inputs = [prep['kl_const'], x_p, w_cat, prep['b_cat'],
              prep['r_mean'], prep['cov_r_inv']]

    if multi_k:
        in_specs = [
            pl.BlockSpec(memory_space=pltpu.MemorySpace.SMEM),       # kl_const
            pl.BlockSpec((tb, tk), lambda i, k: (i, k)),             # x
            pl.BlockSpec((tk, two_hp), lambda i, k: (k, 0)),         # w_cat
            pl.BlockSpec((1, two_hp), lambda i, k: (0, 0)),          # b_cat
            pl.BlockSpec((1, hp), lambda i, k: (0, 0)),              # r_mean
            pl.BlockSpec((1, hp), lambda i, k: (0, 0)),              # cov_r_inv
        ]
        noise_spec = pl.BlockSpec((tb, hp), lambda i, k: (i, 0))
        out_specs = (pl.BlockSpec((tb, hp), lambda i, k: (i, 0)),    # sample
                     pl.BlockSpec((tb, _LANE), lambda i, k: (i, 0)))  # kl
        grid = (n_b, n_k)
        scratch = [pltpu.VMEM((tb, two_hp), jnp.float32)]
        kernel = functools.partial(_bottleneck_kernel_tiled_k, training, hp)
        dims = ("parallel", "arbitrary")
    else:
        in_specs = [
            pl.BlockSpec(memory_space=pltpu.MemorySpace.SMEM),       # kl_const
            pl.BlockSpec((tb, hp), lambda i: (i, 0)),                # x
            pl.BlockSpec((hp, two_hp), lambda i: (0, 0)),            # w_cat (resident)
            pl.BlockSpec((1, two_hp), lambda i: (0, 0)),             # b_cat
            pl.BlockSpec((1, hp), lambda i: (0, 0)),                 # r_mean
            pl.BlockSpec((1, hp), lambda i: (0, 0)),                 # cov_r_inv
        ]
        noise_spec = pl.BlockSpec((tb, hp), lambda i: (i, 0))
        out_specs = (pl.BlockSpec((tb, hp), lambda i: (i, 0)),
                     pl.BlockSpec((tb, _LANE), lambda i: (i, 0)))
        grid = (n_b,)
        scratch = []
        kernel = functools.partial(_bottleneck_kernel_resident, training, hp)
        dims = ("parallel",)

    if training:
        if rng_key is None:
            raise ValueError("training mode requires rng_key")
        # TODO(synk): generate the noise in-kernel (pltpu.prng_seed +
        # pltpu.prng_random_bits) to remove this HBM stream entirely.
        noise = jax.random.normal(rng_key, (bp, hp), jnp.bfloat16)
        in_specs.append(noise_spec)
        inputs.append(noise)

    flops = 2 * bp * hk * two_hp
    transcendentals = 2 * bp * hp                     # log + sqrt
    bytes_accessed = (x_p.size * 2 + w_cat.size * 2
                      + (two_hp + 2 * hp + 1) * 4
                      + (bp * hp * 2 if training else 0)
                      + bp * hp * sample_bytes + bp * _LANE * 4)
    cost = pl.CostEstimate(flops=flops, transcendentals=transcendentals,
                           bytes_accessed=bytes_accessed)

    sample_p, kl_p = pl.pallas_call(
        kernel,
        out_shape=(
            jax.ShapeDtypeStruct((bp, hp), sample_dtype),
            jax.ShapeDtypeStruct((bp, _LANE), jnp.float32),
        ),
        grid_spec=pltpu.PrefetchScalarGridSpec(
            num_scalar_prefetch=0,
            grid=grid,
            in_specs=in_specs,
            out_specs=out_specs,
            scratch_shapes=scratch),
        compiler_params=pltpu.CompilerParams(
            dimension_semantics=dims,
            vmem_limit_bytes=_VMEM_LIMIT),
        cost_estimate=cost,
    )(*inputs)

    return sample_p[:b, :h], kl_p[:b, 0]


# ---------------------------------------------------------------------------
# Reference + test
# ---------------------------------------------------------------------------

def init_params(key, hidden_dim):
    k = jax.random.split(key, 6)
    bound = 1.0 / jnp.sqrt(hidden_dim)
    return {
        'wm': jax.random.uniform(k[0], (hidden_dim, hidden_dim), jnp.float32, -bound, bound),
        'bm': jax.random.uniform(k[1], (hidden_dim,), jnp.float32, -bound, bound),
        'ws': jax.random.uniform(k[2], (hidden_dim, hidden_dim), jnp.float32, -bound, bound),
        'bs': jax.random.uniform(k[3], (hidden_dim,), jnp.float32, -bound, bound),
        'r_mean': jax.random.normal(k[4], (1, hidden_dim), jnp.float32),
        'r_std': jax.random.normal(k[5], (1, hidden_dim), jnp.float32),
    }


def _reference_forward(hidden_state, params, noise):
    # Matmuls use the same bf16-input / f32-accumulate precision as the kernel
    # (the standard TPU MXU treatment); everything else is exact f32.
    xb = hidden_state.astype(jnp.bfloat16)
    wm = params['wm'].astype(jnp.bfloat16)
    ws = params['ws'].astype(jnp.bfloat16)
    mean = jnp.dot(xb, wm.T, preferred_element_type=jnp.float32) + params['bm']
    std = jnp.dot(xb, ws.T, preferred_element_type=jnp.float32) + params['bs']
    cov = std * std + SMALL
    sample = mean if noise is None else mean + noise * jnp.sqrt(cov)
    mean_r = jnp.broadcast_to(params['r_mean'], mean.shape)
    std_r = jnp.broadcast_to(params['r_std'], mean.shape)
    cov_r = std_r * std_r + SMALL
    cov_r_inv = 1.0 / cov_r
    md = mean - mean_r
    h = mean.shape[1]
    kl = 0.5 * (jnp.sum(jnp.log(cov_r), axis=1) - jnp.sum(jnp.log(cov), axis=1)
                - h + jnp.sum(cov_r_inv * cov, axis=1)
                + jnp.sum(md * cov_r_inv * md, axis=1))
    return sample, kl


def _check_case(key, hidden_dim, batch, **fwd_kwargs):
    k_param, k_input, k_noise = jax.random.split(key, 3)
    params = init_params(k_param, hidden_dim)
    prep = prepare_bottleneck_params(params)
    x = jax.random.normal(k_input, (batch, hidden_dim), jnp.float32)

    sample_inf, kl_inf = bottleneck_forward(x, prep, 'inference', None, **fwd_kwargs)
    sample_tr, kl_tr = bottleneck_forward(x, prep, 'training', k_noise, **fwd_kwargs)
    jax.block_until_ready((sample_inf, kl_inf, sample_tr, kl_tr))

    ref_sample, ref_kl = _reference_forward(x, params, None)
    assert sample_inf.shape == (batch, hidden_dim) and kl_inf.shape == (batch,)
    assert sample_tr.shape == (batch, hidden_dim) and kl_tr.shape == (batch,)
    assert jnp.allclose(sample_inf, ref_sample, atol=1e-4, rtol=1e-4)
    assert jnp.allclose(kl_inf, ref_kl, atol=5e-2, rtol=1e-2)
    assert jnp.allclose(kl_tr, ref_kl, atol=5e-2, rtol=1e-2)   # KL is noise-independent
    assert bool(jnp.all(jnp.isfinite(sample_tr)))


if __name__ == "__main__":
    key = jax.random.PRNGKey(0)
    k1, k2 = jax.random.split(key)

    # Resident-weight fast path (H padded to 128, single batch tile).
    _check_case(k1, hidden_dim=32, batch=8)

    # Tiled-K path with batch tiling + padding (forced via a tiny VMEM budget).
    _check_case(k2, hidden_dim=200, batch=70, k_tile=128,
                vmem_budget=600 * 1024)

    print("KERNEL_OK")
</pallas_src>

<mosaic_0001>
module attributes {stable_mosaic.version = 11 : i64} {
  func.func @_bottleneck_kernel_resident(%arg0: i32, %arg1: memref<1x1xf32, #tpu.memory_space<smem>>, %arg2: memref<16x128xbf16, #tpu.memory_space<vmem>>, %arg3: memref<128x256xbf16, #tpu.memory_space<vmem>>, %arg4: memref<1x256xf32, #tpu.memory_space<vmem>>, %arg5: memref<1x128xf32, #tpu.memory_space<vmem>>, %arg6: memref<1x128xf32, #tpu.memory_space<vmem>>, %arg7: memref<16x128xf32, #tpu.memory_space<vmem>>, %arg8: memref<16x128xf32, #tpu.memory_space<vmem>>) attributes {dimension_semantics = [#tpu.dimension_semantics<parallel>], iteration_bounds = array<i64: 1>, scalar_prefetch = 0 : i64, scratch_operands = 0 : i64, tpu.core_type = #tpu.core_type<tc>, window_params = [{transform_indices = @transform_0, window_bounds = array<i64: 1, 1>}, {transform_indices = @transform_1, window_bounds = array<i64: 16, 128>}, {pipeline_mode = #tpu.pipeline_mode<synchronous>, transform_indices = @transform_2, window_bounds = array<i64: 128, 256>}, {pipeline_mode = #tpu.pipeline_mode<synchronous>, transform_indices = @transform_3, window_bounds = array<i64: 1, 256>}, {pipeline_mode = #tpu.pipeline_mode<synchronous>, transform_indices = @transform_4, window_bounds = array<i64: 1, 128>}, {pipeline_mode = #tpu.pipeline_mode<synchronous>, transform_indices = @transform_5, window_bounds = array<i64: 1, 128>}, {transform_indices = @transform_6, window_bounds = array<i64: 16, 128>}, {transform_indices = @transform_7, window_bounds = array<i64: 16, 128>}]} {
    %c0 = arith.constant 0 : index
    %c0_0 = arith.constant 0 : index
    %0 = vector.load %arg2[%c0, %c0_0] : memref<16x128xbf16, #tpu.memory_space<vmem>>, vector<16x128xbf16>
    %c0_1 = arith.constant 0 : index
    %c0_2 = arith.constant 0 : index
    %1 = vector.load %arg3[%c0_1, %c0_2] : memref<128x256xbf16, #tpu.memory_space<vmem>>, vector<128x128xbf16>
    %cst = arith.constant dense<0.000000e+00> : vector<16x128xf32>
    %2 = tpu.matmul %0, %1, %cst {dimension_numbers = #tpu.dot_dimension_numbers<[1], [0], [0], [1], [0, 0, 1, 1], [], []>} : vector<16x128xbf16>, vector<128x128xbf16>, vector<16x128xf32> -> vector<16x128xf32>
    %c0_3 = arith.constant 0 : index
    %c0_4 = arith.constant 0 : index
    %3 = vector.load %arg4[%c0_3, %c0_4] : memref<1x256xf32, #tpu.memory_space<vmem>>, vector<1x128xf32>
    %4 = vector.broadcast %3 : vector<1x128xf32> to vector<16x128xf32>
    %5 = arith.addf %2, %4 : vector<16x128xf32>
    %c0_5 = arith.constant 0 : index
    %c128 = arith.constant 128 : index
    %6 = vector.load %arg3[%c0_5, %c128] : memref<128x256xbf16, #tpu.memory_space<vmem>>, vector<128x128xbf16>
    %cst_6 = arith.constant dense<0.000000e+00> : vector<16x128xf32>
    %7 = tpu.matmul %0, %6, %cst_6 {dimension_numbers = #tpu.dot_dimension_numbers<[1], [0], [0], [1], [0, 0, 1, 1], [], []>} : vector<16x128xbf16>, vector<128x128xbf16>, vector<16x128xf32> -> vector<16x128xf32>
    %c0_7 = arith.constant 0 : index
    %c128_8 = arith.constant 128 : index
    %8 = vector.load %arg4[%c0_7, %c128_8] : memref<1x256xf32, #tpu.memory_space<vmem>>, vector<1x128xf32>
    %9 = vector.broadcast %8 : vector<1x128xf32> to vector<16x128xf32>
    %10 = arith.addf %7, %9 : vector<16x128xf32>
    %11 = arith.mulf %10, %10 : vector<16x128xf32>
    %cst_9 = arith.constant 9.99999993E-9 : f32
    %12 = vector.broadcast %cst_9 : f32 to vector<16x128xf32>
    %13 = arith.addf %11, %12 : vector<16x128xf32>
    %c0_10 = arith.constant 0 : index
    %c0_11 = arith.constant 0 : index
    %14 = vector.load %arg7[%c0_10, %c0_11] : memref<16x128xf32, #tpu.memory_space<vmem>>, vector<16x128xf32>
    tpu.vector_store %arg7[%c0_10, %c0_11], %5 {strides = array<i32>} : memref<16x128xf32, #tpu.memory_space<vmem>>, vector<16x128xf32>,
    %c0_12 = arith.constant 0 : index
    %c0_13 = arith.constant 0 : index
    %15 = vector.load %arg5[%c0_12, %c0_13] : memref<1x128xf32, #tpu.memory_space<vmem>>, vector<1x128xf32>
    %16 = vector.broadcast %15 : vector<1x128xf32> to vector<16x128xf32>
    %17 = arith.subf %5, %16 : vector<16x128xf32>
    %18 = arith.mulf %17, %17 : vector<16x128xf32>
    %19 = arith.addf %13, %18 : vector<16x128xf32>
    %c0_14 = arith.constant 0 : index
    %c0_15 = arith.constant 0 : index
    %20 = vector.load %arg6[%c0_14, %c0_15] : memref<1x128xf32, #tpu.memory_space<vmem>>, vector<1x128xf32>
    %21 = vector.broadcast %20 : vector<1x128xf32> to vector<16x128xf32>
    %22 = arith.mulf %19, %21 : vector<16x128xf32>
    %23 = math.log %13 : vector<16x128xf32>
    %24 = arith.subf %22, %23 : vector<16x128xf32>
    %cst_16 = arith.constant dense<0.000000e+00> : vector<16xf32>
    %25 = vector.multi_reduction <add>, %24, %cst_16 [1] : vector<16x128xf32> to vector<16xf32>
    %26 = vector.shape_cast %25 : vector<16xf32> to vector<16x1xf32>
    %c0_17 = arith.constant 0 : index
    %c0_18 = arith.constant 0 : index
    %27 = memref.load %arg1[%c0_17, %c0_18] : memref<1x1xf32, #tpu.memory_space<smem>>
    %28 = vector.broadcast %27 : f32 to vector<16x1xf32>
    %29 = arith.addf %26, %28 : vector<16x1xf32>
    %cst_19 = arith.constant 5.000000e-01 : f32
    %30 = vector.broadcast %cst_19 : f32 to vector<16x1xf32>
    %31 = arith.mulf %30, %29 : vector<16x1xf32>
    %32 = vector.shape_cast %31 : vector<16x1xf32> to vector<16x1xf32>
    %33 = vector.broadcast %32 : vector<16x1xf32> to vector<16x128xf32>
    %c0_20 = arith.constant 0 : index
    %c0_21 = arith.constant 0 : index
    %34 = vector.load %arg8[%c0_20, %c0_21] : memref<16x128xf32, #tpu.memory_space<vmem>>, vector<16x128xf32>
    tpu.vector_store %arg8[%c0_20, %c0_21], %33 {strides = array<i32>} : memref<16x128xf32, #tpu.memory_space<vmem>>, vector<16x128xf32>,
    return
  }
  func.func @transform_0(%arg0: i32) -> (i32, i32) {
    %c0_i32 = arith.constant 0 : i32
    %c0_i32_0 = arith.constant 0 : i32
    %c0_i32_1 = arith.constant 0 : i32
    return %c0_i32, %c0_i32_0 : i32, i32
  }
  func.func @transform_1(%arg0: i32) -> (i32, i32) {
    %c0_i32 = arith.constant 0 : i32
    %c0_i32_0 = arith.constant 0 : i32
    return %arg0, %c0_i32 : i32, i32
  }
  func.func @transform_2(%arg0: i32) -> (i32, i32) {
    %c0_i32 = arith.constant 0 : i32
    %c0_i32_0 = arith.constant 0 : i32
    %c0_i32_1 = arith.constant 0 : i32
    return %c0_i32, %c0_i32_0 : i32, i32
  }
  func.func @transform_3(%arg0: i32) -> (i32, i32) {
    %c0_i32 = arith.constant 0 : i32
    %c0_i32_0 = arith.constant 0 : i32
    %c0_i32_1 = arith.constant 0 : i32
    return %c0_i32, %c0_i32_0 : i32, i32
  }
  func.func @transform_4(%arg0: i32) -> (i32, i32) {
    %c0_i32 = arith.constant 0 : i32
    %c0_i32_0 = arith.constant 0 : i32
    %c0_i32_1 = arith.constant 0 : i32
    return %c0_i32, %c0_i32_0 : i32, i32
  }
  func.func @transform_5(%arg0: i32) -> (i32, i32) {
    %c0_i32 = arith.constant 0 : i32
    %c0_i32_0 = arith.constant 0 : i32
    %c0_i32_1 = arith.constant 0 : i32
    return %c0_i32, %c0_i32_0 : i32, i32
  }
  func.func @transform_6(%arg0: i32) -> (i32, i32) {
    %c0_i32 = arith.constant 0 : i32
    %c0_i32_0 = arith.constant 0 : i32
    return %arg0, %c0_i32 : i32, i32
  }
  func.func @transform_7(%arg0: i32) -> (i32, i32) {
    %c0_i32 = arith.constant 0 : i32
    %c0_i32_0 = arith.constant 0 : i32
    return %arg0, %c0_i32 : i32, i32
  }
}

</mosaic_0001>

<bundles_post_ra>
// kernel: tpu_custom_call.1
= control target key start
LH: loop header
LB: loop body
LE: loop exit
PB: predicated region body
PF: predicated region fallthrough
CT: control target
= control target key end

     0   :  { %14 = vsyncpa [#allocation4], 0  ;;  %s697_s0 = inlined_call_operand.<no memory space> [shape: f32[1,1], index: 0, kind: input, shape index: {}]   ;;  %s698_s1 = inlined_call_operand.hbm [shape: bf16[16,128], index: 1, kind: input, shape index: {}]   ;;  %s699_s2 = inlined_call_operand.hbm [shape: bf16[128,256], index: 2, kind: input, shape index: {}]   ;;  %s700_s3 = inlined_call_operand.vmem [shape: f32[1,256], index: 3, kind: input, shape index: {}]   ;;  %s701_s4 = inlined_call_operand.vmem [shape: f32[1,128], index: 4, kind: input, shape index: {}]   ;;  %s702_s5 = inlined_call_operand.vmem [shape: f32[1,128], index: 5, kind: input, shape index: {}]   ;;  %s703_s6 = inlined_call_operand.hbm [shape: f32[16,128], index: 6, kind: output, shape index: {0}]   ;;  %s704_s7 = inlined_call_operand.hbm [shape: f32[16,128], index: 7, kind: output, shape index: {1}]  }
   0x1   :  { %15 = vsyncpa [#allocation7], 0 }
   0x2   :  { %16 = vsyncpa [#allocation5], 0 }
   0x3   :  { %17 = vsyncpa [#allocation10], 0  ;;  %s575_s24 = smov [#allocation3]   ;;  %s479_s28 = scalar_lea.hbm %s698_s1, 128 }
   0x4   :  { %s25_s25 = sshll.u32 %s575_s24, 4  ;;  %p480_p0 = scmp.ne.s32.totalorder %s698_s1, %s479_s28  ;;  %s26_s25 = int_to_ptr.vmem [resolvable:$true] %s25_s25 }
   0x5   :  { %p483_p1 = scmp.lt.u32.totalorder %s479_s28, %s698_s1 }
   0x7   :  { %p485_p2 = pnand %p483_p1, %p480_p0 }
   0x9   :  { %488 = shalt.err (!%p485_p2)
}
   0xa   :  { %s489_s10 = scalar_lea.vmem %s26_s25, 128  ;;  %p494_p4 = scmp.lt.s32.totalorder %s26_s25, %s26_s25 }
   0xb   :  { %p490_p3 = scmp.ne.s32.totalorder %s26_s25, %s489_s10  ;;  %p495_p5 = scmp.lt.s32.totalorder %s489_s10, %s489_s10 }
   0xd   :  { %p496_p6 = por %p495_p5, %p494_p4 }
   0xf   :  { %p497_p7 = pnand %p496_p6, %p490_p3 }
  0x11   :  { %500 = shalt.err (!%p497_p7)
}
  0x12   :  { %s576_s11 = smov 64   ;;  %s577_s12 = smov 4  }
  0x13   :  { %31 = dma.hbm_to_vmem [thread:$0]  %s698_s1, 128, %s26_s25, [#allocation4], %s576_s11, %s576_s11, %s577_s12  }
  0x14   :  { %s578_s15 = smov [#allocation6]   ;;  %s501_s19 = scalar_lea.hbm %s699_s2, 2048 }
  0x15   :  { %s37_s16 = sshll.u32 %s578_s15, 4  ;;  %p502_p8 = scmp.ne.s32.totalorder %s699_s2, %s501_s19  ;;  %s38_s16 = int_to_ptr.vmem [resolvable:$true] %s37_s16 }
  0x16   :  { %p505_p9 = scmp.lt.u32.totalorder %s501_s19, %s699_s2 }
  0x18   :  { %p507_p10 = pnand %p505_p9, %p502_p8 }
  0x1a   :  { %510 = shalt.err (!%p507_p10)
}
  0x1b   :  { %s511_s24 = scalar_lea.vmem %s38_s16, 2048  ;;  %p516_p12 = scmp.lt.s32.totalorder %s38_s16, %s38_s16 }
  0x1c   :  { %p512_p11 = scmp.ne.s32.totalorder %s38_s16, %s511_s24  ;;  %p517_p13 = scmp.lt.s32.totalorder %s511_s24, %s511_s24 }
  0x1e   :  { %p518_p0 = por %p517_p13, %p516_p12 }
  0x20   :  { %p519_p1 = pnand %p518_p0, %p512_p11 }
  0x22   :  { %522 = shalt.err (!%p519_p1)
}
  0x23   :  { %s579_s1 = smov 128   ;;  %s580_s25 = smov 8  }
  0x24   :  { %43 = dma.hbm_to_vmem [thread:$0]  %s699_s2, 2048, %s38_s16, [#allocation7], %s579_s1, %s579_s1, %s580_s25  }
  0x25   :  { %567 = dma.done.wait [#allocation4], 128  }
  0x26   :  { %568 = vsyncadd [#allocation4], 4294967168 }
  0x27   :  { %569 = dma.done.wait [#allocation7], 2048  }
  0x28   :  { %570 = vsyncadd [#allocation7], 4294965248  ;;  %v581_v0 = vmov 0.0   ;;  %vm582_vm0 = vmmov 0   ;;  %v458_v1 = vld [vmem:[#allocation6] ss:$8 sps:$4 sm:$0xff]  }
  0x29   :  { %408 = vmatprep.subr.bf16.mxu0 %v581_v0  ;;  %428 = vmatprep.subr.bf16.mxu1 %v581_v0  ;;  %v459_v2 = vld [vmem:[#allocation6 + $0x4] ss:$8 sps:$4 sm:$0xff]   ;;  %v460_v3 = vld [vmem:[#allocation6 + $0x10] ss:$8 sps:$4 sm:$0xff]   ;;  %v461_v4 = vld [vmem:[#allocation6 + $0x14] ss:$8 sps:$4 sm:$0xff]  }
  0x2a   :  { %424 = vmatprep.mubr.msk.bf16.mxu0 %vm582_vm0, %v581_v0  ;;  %444 = vmatprep.mubr.msk.bf16.mxu1 %vm582_vm0, %v581_v0  ;;  %v462_v5 = vld [vmem:[#allocation6 + $0x20] ss:$8 sps:$4 sm:$0xff]   ;;  %v463_v6 = vld [vmem:[#allocation6 + $0x24] ss:$8 sps:$4 sm:$0xff]   ;;  %v464_v7 = vld [vmem:[#allocation6 + $0x30] ss:$8 sps:$4 sm:$0xff]  }
  0x2b   :  { %409 = vmatpush3.bf16.msra.mxu0 %v458_v1  ;;  %429 = vmatpush3.bf16.msra.mxu1 %v459_v2  ;;  %v465_v8 = vld [vmem:[#allocation6 + $0x34] ss:$8 sps:$4 sm:$0xff]   ;;  %v466_v9 = vld [vmem:[#allocation6 + $0x40] ss:$8 sps:$4 sm:$0xff]   ;;  %v467_v10 = vld [vmem:[#allocation6 + $0x44] ss:$8 sps:$4 sm:$0xff]  }
  0x2c   :  { %410 = vmatprep.subr.bf16.mxu0 %v581_v0  ;;  %430 = vmatprep.subr.bf16.mxu1 %v581_v0  ;;  %v468_v11 = vld [vmem:[#allocation6 + $0x50] ss:$8 sps:$4 sm:$0xff]   ;;  %v469_v12 = vld [vmem:[#allocation6 + $0x54] ss:$8 sps:$4 sm:$0xff]   ;;  %v470_v13 = vld [vmem:[#allocation6 + $0x60] ss:$8 sps:$4 sm:$0xff]  }
  0x2d   :  { %v471_v14 = vld [vmem:[#allocation6 + $0x64] ss:$8 sps:$4 sm:$0xff]   ;;  %v472_v15 = vld [vmem:[#allocation6 + $0x70] ss:$8 sps:$4 sm:$0xff]   ;;  %v473_v16 = vld [vmem:[#allocation6 + $0x74] ss:$8 sps:$4 sm:$0xff]  }
  0x2e   :  { %v474_v17 = vld [vmem:[#allocation3] sm:$0xff]   ;;  %s583_s10 = smov [#allocation8]  }
  0x2f   :  { %411 = vmatpush3.bf16.msra.mxu0 %v460_v3  ;;  %431 = vmatpush3.bf16.msra.mxu1 %v461_v4  ;;  %v369_v18 = vld [vmem:[%s700_s3] ss:$0 sm:$0xff]  ;;  %v379_v19 = vld [vmem:[%s700_s3 + $0x1] ss:$0 sm:$0xff]  ;;  %s340_s11 = sshll.u32 %s583_s10, 4  ;;  %s341_s11 = int_to_ptr.vmem [resolvable:$true] %s340_s11 }
  0x30   :  { %412 = vmatprep.subr.bf16.mxu0 %v581_v0  ;;  %432 = vmatprep.subr.bf16.mxu1 %v581_v0  ;;  %v388_v21 = vld [vmem:[%s701_s4] ss:$0 sm:$0xff]  ;;  %s523_s12 = scalar_lea.vmem %s341_s11, 256  ;;  %p528_p3 = scmp.lt.s32.totalorder %s341_s11, %s341_s11 }
  0x31   :  { %v389_v43 = vld [vmem:[%s702_s5] ss:$0 sm:$0xff]  ;;  %p524_p2 = scmp.ne.s32.totalorder %s341_s11, %s523_s12  ;;  %p529_p4 = scmp.lt.s32.totalorder %s523_s12, %s523_s12 }
  0x33   :  { %413 = vmatpush3.bf16.msra.mxu0 %v462_v5  ;;  %433 = vmatpush3.bf16.msra.mxu1 %v463_v6  ;;  %p530_p5 = por %p529_p4, %p528_p3 }
  0x34   :  { %414 = vmatprep.subr.bf16.mxu0 %v581_v0  ;;  %434 = vmatprep.subr.bf16.mxu1 %v581_v0 }
  0x35   :  { %p531_p6 = pnand %p530_p5, %p524_p2 }
  0x37   :  { %415 = vmatpush3.bf16.msra.mxu0 %v464_v7  ;;  %435 = vmatpush3.bf16.msra.mxu1 %v465_v8 }
  0x38   :  { %416 = vmatprep.subr.bf16.mxu0 %v581_v0  ;;  %436 = vmatprep.subr.bf16.mxu1 %v581_v0 }
  0x3b   :  { %417 = vmatpush3.bf16.msra.mxu0 %v466_v9  ;;  %437 = vmatpush3.bf16.msra.mxu1 %v467_v10 }
  0x3c   :  { %418 = vmatprep.subr.bf16.mxu0 %v581_v0  ;;  %438 = vmatprep.subr.bf16.mxu1 %v581_v0 }
  0x3f   :  { %419 = vmatpush3.bf16.msra.mxu0 %v468_v11  ;;  %439 = vmatpush3.bf16.msra.mxu1 %v469_v12 }
  0x40   :  { %420 = vmatprep.subr.bf16.mxu0 %v581_v0  ;;  %440 = vmatprep.subr.bf16.mxu1 %v581_v0 }
  0x43   :  { %421 = vmatpush3.bf16.msra.mxu0 %v470_v13  ;;  %441 = vmatpush3.bf16.msra.mxu1 %v471_v14 }
  0x44   :  { %422 = vmatprep.subr.bf16.mxu0 %v581_v0  ;;  %442 = vmatprep.subr.bf16.mxu1 %v581_v0 }
  0x47   :  { %423 = vmatpush3.bf16.msra.mxu0 %v472_v15  ;;  %443 = vmatpush3.bf16.msra.mxu1 %v473_v16 }
  0x4a   :  { %425 = vmatmul.mubr.bf16.vlgmr.msra.gmra.mrb[0].mxu0 %v474_v17  ;;  %445 = vmatmul.mubr.bf16.vlgmr.msra.gmra.mrb[0].mxu1 %v474_v17 }
 0x11d   :  { %v170_v20 = vpop.f32.mrb[0].mxu0  ;;  %v282_v23 = vpop.f32.mrb[0].mxu1 }
 0x11e   :  { %v171_v22 = vadd.f32 %v369_v18, %v170_v20  ;;  %v426_v24 = vpop.f32.mrb[1].mxu0  ;;  %v283_v25 = vadd.f32 %v379_v19, %v282_v23  ;;  %v446_v26 = vpop.f32.mrb[1].mxu1 }
 0x11f   :  { %v173_v27 = vpop.f32.mrb[2].mxu0  ;;  %v285_v30 = vpop.f32.mrb[2].mxu1 }
 0x120   :  { %293 = vst [vmem:[#allocation8] sm:$0xff] %v171_v22  ;;  %v302_v28 = vsub.f32 %v171_v22, %v388_v21  ;;  %v174_v29 = vadd.f32 %v369_v18, %v173_v27  ;;  %v427_v31 = vpop.f32.mrb[3].mxu0  ;;  %v289_v32 = vmul.f32 %v283_v25, %v283_v25  ;;  %v286_v33 = vadd.f32 %v379_v19, %v285_v30  ;;  %v447_v34 = vpop.f32.mrb[3].mxu1 }
 0x122   :  { %v304_v35 = vmul.f32 %v302_v28, %v302_v28  ;;  %294 = vst [vmem:[#allocation8 + $0x8] sm:$0xff] %v174_v29  ;;  %v303_v36 = vsub.f32 %v174_v29, %v388_v21  ;;  %v291_v37 = vadd.f32 1e-08, %v289_v32  ;;  %v290_v38 = vmul.f32 %v286_v33, %v286_v33 }
 0x124   :  { %v305_v39 = vmul.f32 %v303_v36, %v303_v36  ;;  %v306_v40 = vadd.f32 %v304_v35, %v291_v37  ;;  %475 = vlog2.f32 %v291_v37  ;;  %v292_v41 = vadd.f32 1e-08, %v290_v38 }
 0x126   :  { %v307_v42 = vadd.f32 %v305_v39, %v292_v41  ;;  %477 = vlog2.f32 %v292_v41  ;;  %v315_v45 = vmul.f32 %v389_v43, %v306_v40 }
 0x128   :  { %v316_v49 = vmul.f32 %v389_v43, %v307_v42 }
 0x12e   :  { %v476_v44 = vpop.eup %475 }
 0x12f   :  { %v318_v46 = vmul.f32 0.6931472, %v476_v44 }
 0x130   :  { %v478_v47 = vpop.eup %477 }
 0x131   :  { %v321_v48 = vsub.f32 %v315_v45, %v318_v46  ;;  %v320_v50 = vmul.f32 0.6931472, %v478_v47 }
 0x133   :  { %323 = vadd.xlane.f32.xlu0 %v321_v48  ;;  %v322_v51 = vsub.f32 %v316_v49, %v320_v50 }
 0x137   :  { %325 = vadd.xlane.f32.xlu0 %v322_v51 }
 0x138   :  { %534 = shalt.err (!%p531_p6)
}
 0x139   :  { %s535_s14 = scalar_lea.hbm %s703_s6, 256 }
 0x13a   :  { %p536_p7 = scmp.ne.s32.totalorder %s703_s6, %s535_s14  ;;  %p539_p8 = scmp.lt.u32.totalorder %s535_s14, %s703_s6 }
 0x13c   :  { %p541_p9 = pnand %p539_p8, %p536_p7 }
 0x13e   :  { %544 = shalt.err (!%p541_p9)
}
 0x13f   :  { %346 = dma.vmem_to_hbm [thread:$0]  %s341_s11, 256, %s703_s6, [#allocation5], %s579_s1, %s579_s1, %s580_s25  }
 0x140   :  { %v328_v52 = vstv %s697_s0  ;;  %s584_s23 = smov [#allocation9]  }
 0x141   :  { %s352_s24 = sshll.u32 %s584_s23, 4  ;;  %s353_s24 = int_to_ptr.vmem [resolvable:$true] %s352_s24 }
 0x142   :  { %s545_s26 = scalar_lea.vmem %s353_s24, 256  ;;  %p550_p11 = scmp.lt.s32.totalorder %s353_s24, %s353_s24 }
 0x143   :  { %p546_p10 = scmp.ne.s32.totalorder %s353_s24, %s545_s26  ;;  %p551_p12 = scmp.lt.s32.totalorder %s545_s26, %s545_s26 }
 0x145   :  { %p552_p13 = por %p551_p12, %p550_p11 }
 0x147   :  { %p553_p0 = pnand %p552_p13, %p546_p10 }
 0x1c0   :  { %v324_v53 = vpop.xlane.xlu0 %323 }
 0x1c1   :  { %v329_v54 = vadd.f32 %v328_v52, %v324_v53 }
 0x1c3   :  { %v331_v55 = vmul.f32 0.5, %v329_v54 }
 0x1c4   :  { %v326_v56 = vpop.xlane.xlu0 %325 }
 0x1c5   :  { %333 = vst [vmem:[#allocation9] sm:$0xff] %v331_v55  ;;  %v330_v57 = vadd.f32 %v328_v52, %v326_v56 }
 0x1c7   :  { %v332_v58 = vmul.f32 0.5, %v330_v57 }
 0x1c9   :  { %334 = vst [vmem:[#allocation9 + $0x8] sm:$0xff] %v332_v58 }
 0x1ca   :  { %556 = shalt.err (!%p553_p0)
}
 0x1cb   :  { %s557_s27 = scalar_lea.hbm %s704_s7, 256 }
 0x1cc   :  { %p558_p1 = scmp.ne.s32.totalorder %s704_s7, %s557_s27  ;;  %p561_p2 = scmp.lt.u32.totalorder %s557_s27, %s704_s7 }
 0x1ce   :  { %p563_p3 = pnand %p561_p2, %p558_p1 }
 0x1d0   :  { %566 = shalt.err (!%p563_p3)
}
 0x1d1   :  { %358 = dma.vmem_to_hbm [thread:$0]  %s353_s24, 256, %s704_s7, [#allocation10], %s579_s1, %s579_s1, %s580_s25  }
 0x1d2   :  { %571 = dma.done.wait [#allocation5], 256  }
 0x1d3   :  { %572 = vsyncadd [#allocation5], 4294967040 }
 0x1d4   :  { %573 = dma.done.wait [#allocation10], 256  }
 0x1d5   :  { %574 = vsyncadd [#allocation10], 4294967040 }
 0x1d6   :  { %365 = vsyncpa [#allocation4], 1 }
 0x1d7   :  { %366 = vsyncpa [#allocation7], 1 }
 0x1d8   :  { %367 = vsyncpa [#allocation5], 1 }
 0x1d9   :  { %368 = vsyncpa [#allocation10], 1 }

</bundles_post_ra>
